<compile_context>
chip_gen: v7x
topology: tpu7x:2x2x1
jax: 0.10.0
libtpu: 0.0.40
codegen_flags: <defaults>
</compile_context>

<pallas_src>
import functools

import jax
import jax.numpy as jnp
import numpy as np
from jax import lax
from jax.experimental import pallas as pl
from jax.experimental.pallas import tpu as pltpu


def _inverted_residual_kernel(W, x_ref, w1_ref, dw_ref, b2_ref, w2_ref,
                              b3_ref, o_ref):
    """One grid step: all channels x a lane-dense flattened-spatial slab.

      x_ref : (1, C+1, Lk)  input with a trailing all-ones channel (bias row)
      w1_ref: (Hd, C+1)     1x1 expand weights, BN1 scale folded, b1 last col
      dw_ref: (9, Hd, Lk)   3x3 depthwise taps, BN2 scale AND boundary masks
                            pre-baked per lane (tap k = (di+1)*3 + (dj+1))
      b2_ref: (Hd, Lk)      BN2 bias, pre-broadcast over lanes
      w2_ref: (Cout, Hd)    1x1 project weights, BN3 scale folded
      b3_ref: (Cout, Lk)    BN3 bias, pre-broadcast over lanes
      o_ref : (1, Cout, Lk)
    """
    Cout = o_ref.shape[1]
    xa = x_ref[0]                                      # (C+1, Lk) f32
    Lk = xa.shape[1]

    # ---- 1x1 expand conv (BN1 scale+bias folded into the dot) + ReLU6 : MXU --
    h = jnp.dot(w1_ref[...], xa, preferred_element_type=jnp.float32)  # (Hd, Lk)
    h = jnp.clip(h, 0.0, 6.0)

    # ---- 3x3 depthwise conv, stride 1, pad 1 : separable roll form ----------
    # Column neighbours once (2 lane rolls on the XLU); boundary zeros come
    # from the masks baked into dw_ref, so no in-kernel selects at all.
    h_l = pltpu.roll(h, shift=1, axis=1)               # h[p-1]
    h_r = pltpu.roll(h, shift=Lk - 1, axis=1)          # h[p+1]
    d = [dw_ref[k] for k in range(9)]                  # plain VMEM loads
    # Three per-row-offset weighted sums (9 multiplies total).
    t_m1 = d[0] * h_l + d[1] * h + d[2] * h_r          # row offset -1
    t_0 = d[3] * h_l + d[4] * h + d[5] * h_r           # row offset  0
    t_p1 = d[6] * h_l + d[7] * h + d[8] * h_r          # row offset +1
    # Only two more rolls (by +-W) to align the off-row sums.
    acc = (t_0 + pltpu.roll(t_m1, shift=W, axis=1)
           + pltpu.roll(t_p1, shift=Lk - W, axis=1))
    acc = jnp.clip(acc + b2_ref[...], 0.0, 6.0)

    # ---- 1x1 project conv (BN3 scale folded) : MXU ; bias + residual : VPU --
    out = jnp.dot(w2_ref[...], acc, preferred_element_type=jnp.float32)  # (Cout, Lk)
    out = out + b3_ref[...] + xa[:Cout, :]
    o_ref[0] = out.astype(o_ref.dtype)


def _tap_masks(H, W, n_images, dtype=jnp.float32):
    """Per-lane boundary masks for the 9 depthwise taps over n_images*(H*W) lanes.

    Row masks are expressed at the roll *source* position (pre row-roll), which
    makes the circular rolls -- including wrap across image seams when the
    batch is folded into lanes -- exactly equivalent to zero padding.
    """
    L = H * W
    pos = jnp.arange(n_images * L, dtype=jnp.int32) % L   # per-image position
    row = pos // W
    col = pos % W
    ones = jnp.ones_like(col, dtype=dtype)
    col_ok = {-1: (col >= 1).astype(dtype), 0: ones,
              1: (col <= W - 2).astype(dtype)}
    row_ok = {-1: (row <= H - 2).astype(dtype), 0: ones,
              1: (row >= 1).astype(dtype)}
    masks = []
    for di in (-1, 0, 1):
        for dj in (-1, 0, 1):
            masks.append(row_ok[di] * col_ok[dj])
    return jnp.stack(masks)                               # (9, n_images*L)


def _is_single_tensorcore_chip():
    """True for single-TC chips (v5e/v6e) -> fold batch into lanes, grid=(1,)."""
    try:
        kind = jax.devices()[0].device_kind.lower()
    except Exception:
        return True
    return not any(tag in kind for tag in ("v7", "v4", "v5p"))


def inverted_residual_pallas(x_nchw, w1_s, b1, dw_s, b2, w2_s, b3,
                             *, fold_batch=None):
    """x_nchw: (N, C, H, W) f32.  Weights already have BN scales folded in:

      w1_s: (Hd, C)     b1: (Hd,)
      dw_s: (Hd, 9)     b2: (Hd,)     taps row-major: k = ki*3 + kj
      w2_s: (Cout, Hd)  b3: (Cout,)

    Returns (N, Cout, H, W) f32.  Implements the stride==1, inp==oup,
    expand_ratio>1 InvertedResidual variant (residual connection active).
    """
    N, C, H, W = x_nchw.shape
    L = H * W
    Hd, Cw = w1_s.shape
    Cout = w2_s.shape[0]
    assert Cw == C and Cout == C, (
        "only the stride==1, inp==oup residual InvertedResidual variant "
        "is implemented")
    # TODO(synk): stride=2 and expand_ratio=1 module variants are not exercised
    # by this configuration and are not implemented here.

    if fold_batch is None:
        fold_batch = _is_single_tensorcore_chip()

    if fold_batch:
        # Single-TC chips: one grid step over (C, N*L) lanes.
        G, Lk = 1, N * L
        x = x_nchw.reshape(N, C, L).transpose(1, 0, 2).reshape(1, C, Lk)
    else:
        # Multi-TC chips (v7x): one image per grid step, "parallel" semantics.
        G, Lk = N, L
        x = x_nchw.reshape(N, C, L)

    f32 = jnp.float32
    # Ones channel so the expand MXU dot also applies the BN1 bias.
    x_aug = jnp.concatenate([x.astype(f32), jnp.ones((G, 1, Lk), f32)], axis=1)
    w1_aug = jnp.concatenate([w1_s, b1[:, None]], axis=1).astype(f32)  # (Hd, C+1)
    # Depthwise taps: bake boundary masks per lane (BN2 scale already folded).
    masks = _tap_masks(H, W, Lk // L, f32)                             # (9, Lk)
    dw_full = dw_s.T.astype(f32)[:, :, None] * masks[:, None, :]       # (9, Hd, Lk)
    b2_b = jnp.broadcast_to(b2.astype(f32)[:, None], (Hd, Lk))
    b3_b = jnp.broadcast_to(b3.astype(f32)[:, None], (Cout, Lk))
    w2_f = w2_s.astype(f32)

    kernel = functools.partial(_inverted_residual_kernel, W)

    grid_spec = pltpu.PrefetchScalarGridSpec(
        num_scalar_prefetch=0,
        grid=(G,),
        in_specs=[
            pl.BlockSpec((1, C + 1, Lk), lambda n: (n, 0, 0)),
            pl.BlockSpec((Hd, C + 1), lambda n: (0, 0)),
            pl.BlockSpec((9, Hd, Lk), lambda n: (0, 0, 0)),
            pl.BlockSpec((Hd, Lk), lambda n: (0, 0)),
            pl.BlockSpec((Cout, Hd), lambda n: (0, 0)),
            pl.BlockSpec((Cout, Lk), lambda n: (0, 0)),
        ],
        out_specs=pl.BlockSpec((1, Cout, Lk), lambda n: (n, 0, 0)),
    )

    out = pl.pallas_call(
        kernel,
        out_shape=jax.ShapeDtypeStruct((G, Cout, Lk), jnp.float32),
        grid_spec=grid_spec,
        compiler_params=pltpu.CompilerParams(
            dimension_semantics=("parallel",)),
    )(x_aug, w1_aug, dw_full, b2_b, w2_f, b3_b)

    if fold_batch:
        out = out.reshape(Cout, N, L).transpose(1, 0, 2)
    return out.reshape(N, Cout, H, W)


def _fold_bn(gamma, beta, mean, var, eps=1e-5):
    scale = gamma / jnp.sqrt(var + eps)
    bias = beta - mean * scale
    return scale, bias


def _reference_nchw(x, w1_t, dw_t, w2_t, bn1, bn2, bn3, hidden):
    """Pure-JAX reference mirroring the PyTorch forward (NCHW, OIHW)."""
    dn = ("NCHW", "OIHW", "NCHW")

    def bn(y, p):
        s, b = p
        return y * s[None, :, None, None] + b[None, :, None, None]

    y = lax.conv_general_dilated(x, w1_t, (1, 1), "VALID", dimension_numbers=dn)
    y = jnp.clip(bn(y, bn1), 0.0, 6.0)
    y = lax.conv_general_dilated(y, dw_t, (1, 1), ((1, 1), (1, 1)),
                                 feature_group_count=hidden,
                                 dimension_numbers=dn)
    y = jnp.clip(bn(y, bn2), 0.0, 6.0)
    y = lax.conv_general_dilated(y, w2_t, (1, 1), "VALID", dimension_numbers=dn)
    y = bn(y, bn3)
    return x + y


if __name__ == "__main__":
    # InvertedResidual(inp=4, oup=4, stride=1, expand_ratio=6)
    N, C, Hsp, Wsp = 2, 4, 16, 16
    inp, oup, stride, expand_ratio = 4, 4, 1, 6
    hidden = round(inp * expand_ratio)        # 24

    key = jax.random.PRNGKey(0)
    keys = jax.random.split(key, 10)

    x_nchw = jax.random.normal(keys[0], (N, C, Hsp, Wsp), jnp.float32)

    # PyTorch-shaped conv weights (OIHW).
    w1_torch = jax.random.normal(keys[1], (hidden, inp, 1, 1), jnp.float32) * 0.2
    dw_torch = jax.random.normal(keys[2], (hidden, 1, 3, 3), jnp.float32) * 0.2
    w2_torch = jax.random.normal(keys[3], (oup, hidden, 1, 1), jnp.float32) * 0.2

    # Deterministic (eval-mode) BatchNorm parameters.
    def bn_params(k, ch):
        k1, k2, k3, k4 = jax.random.split(k, 4)
        gamma = 1.0 + 0.1 * jax.random.normal(k1, (ch,), jnp.float32)
        beta = 0.1 * jax.random.normal(k2, (ch,), jnp.float32)
        mean = 0.1 * jax.random.normal(k3, (ch,), jnp.float32)
        var = jnp.abs(jax.random.normal(k4, (ch,), jnp.float32)) + 0.5
        return gamma, beta, mean, var

    bn1 = _fold_bn(*bn_params(keys[4], hidden))
    bn2 = _fold_bn(*bn_params(keys[5], hidden))
    bn3 = _fold_bn(*bn_params(keys[6], oup))

    # Kernel-layout weights with BN scales folded in (constant*constant, done
    # once in the wrapper -- removes three full-activation VPU multiplies).
    s1, b1v = bn1
    s2, b2v = bn2
    s3, b3v = bn3
    w1_k = w1_torch[:, :, 0, 0] * s1[:, None]                     # (hidden, inp)
    dw_k = dw_torch[:, 0, :, :].reshape(hidden, 9) * s2[:, None]  # (hidden, 9)
    w2_k = w2_torch[:, :, 0, 0] * s3[:, None]                     # (oup, hidden)

    ref = _reference_nchw(x_nchw, w1_torch, dw_torch, w2_torch,
                          bn1, bn2, bn3, hidden)

    # Auto-detected grid layout for the current chip...
    out_auto = jax.block_until_ready(
        inverted_residual_pallas(x_nchw, w1_k, b1v, dw_k, b2v, w2_k, b3v))
    np.testing.assert_allclose(np.asarray(out_auto), np.asarray(ref),
                               rtol=1e-4, atol=1e-4)
    # ...and both explicit layouts (batch-folded grid=(1,) and per-image
    # grid=(N,)) to guard correctness on every TPU generation.
    for fold in (True, False):
        out = jax.block_until_ready(
            inverted_residual_pallas(x_nchw, w1_k, b1v, dw_k, b2v, w2_k, b3v,
                                     fold_batch=fold))
        np.testing.assert_allclose(np.asarray(out), np.asarray(ref),
                                   rtol=1e-4, atol=1e-4)

    print("KERNEL_OK")
</pallas_src>

<mosaic_0001>
module attributes {stable_mosaic.version = 11 : i64} {
  func.func @_inverted_residual_kernel(%arg0: i32, %arg1: memref<1x5x512xf32, #tpu.memory_space<vmem>>, %arg2: memref<24x5xf32, #tpu.memory_space<vmem>>, %arg3: memref<9x24x512xf32, #tpu.memory_space<vmem>>, %arg4: memref<24x512xf32, #tpu.memory_space<vmem>>, %arg5: memref<4x24xf32, #tpu.memory_space<vmem>>, %arg6: memref<4x512xf32, #tpu.memory_space<vmem>>, %arg7: memref<1x4x512xf32, #tpu.memory_space<vmem>>) attributes {dimension_semantics = [#tpu.dimension_semantics<parallel>], iteration_bounds = array<i64: 1>, scalar_prefetch = 0 : i64, scratch_operands = 0 : i64, tpu.core_type = #tpu.core_type<tc>, window_params = [{transform_indices = @transform_0, window_bounds = array<i64: 1, 5, 512>}, {pipeline_mode = #tpu.pipeline_mode<synchronous>, transform_indices = @transform_1, window_bounds = array<i64: 24, 5>}, {pipeline_mode = #tpu.pipeline_mode<synchronous>, transform_indices = @transform_2, window_bounds = array<i64: 9, 24, 512>}, {pipeline_mode = #tpu.pipeline_mode<synchronous>, transform_indices = @transform_3, window_bounds = array<i64: 24, 512>}, {pipeline_mode = #tpu.pipeline_mode<synchronous>, transform_indices = @transform_4, window_bounds = array<i64: 4, 24>}, {pipeline_mode = #tpu.pipeline_mode<synchronous>, transform_indices = @transform_5, window_bounds = array<i64: 4, 512>}, {transform_indices = @transform_6, window_bounds = array<i64: 1, 4, 512>}]} {
    %c0 = arith.constant 0 : index
    %c0_0 = arith.constant 0 : index
    %c0_1 = arith.constant 0 : index
    %0 = vector.load %arg1[%c0, %c0_0, %c0_1] : memref<1x5x512xf32, #tpu.memory_space<vmem>>, vector<1x5x512xf32>
    %1 = vector.shape_cast %0 : vector<1x5x512xf32> to vector<5x512xf32>
    %c0_2 = arith.constant 0 : index
    %c0_3 = arith.constant 0 : index
    %2 = vector.load %arg2[%c0_2, %c0_3] : memref<24x5xf32, #tpu.memory_space<vmem>>, vector<24x5xf32>
    %cst = arith.constant dense<0.000000e+00> : vector<24x512xf32>
    %3 = tpu.matmul %2, %1, %cst {dimension_numbers = #tpu.dot_dimension_numbers<[1], [0], [0], [1], [0, 0, 1, 1], [], []>} : vector<24x5xf32>, vector<5x512xf32>, vector<24x512xf32> -> vector<24x512xf32>
    %cst_4 = arith.constant 0.000000e+00 : f32
    %cst_5 = arith.constant 6.000000e+00 : f32
    %4 = vector.broadcast %cst_4 : f32 to vector<24x512xf32>
    %5 = arith.maximumf %4, %3 : vector<24x512xf32>
    %6 = vector.broadcast %cst_5 : f32 to vector<24x512xf32>
    %7 = arith.minimumf %6, %5 : vector<24x512xf32>
    %c1_i32 = arith.constant 1 : i32
    %8 = tpu.dynamic_rotate %7 by %c1_i32 dim 1 : vector<24x512xf32>, i32 -> vector<24x512xf32>
    %c511_i32 = arith.constant 511 : i32
    %9 = tpu.dynamic_rotate %7 by %c511_i32 dim 1 : vector<24x512xf32>, i32 -> vector<24x512xf32>
    %c0_6 = arith.constant 0 : index
    %c0_7 = arith.constant 0 : index
    %c0_8 = arith.constant 0 : index
    %10 = vector.load %arg3[%c0_6, %c0_7, %c0_8] : memref<9x24x512xf32, #tpu.memory_space<vmem>>, vector<1x24x512xf32>
    %11 = vector.shape_cast %10 : vector<1x24x512xf32> to vector<24x512xf32>
    %c1 = arith.constant 1 : index
    %c0_9 = arith.constant 0 : index
    %c0_10 = arith.constant 0 : index
    %12 = vector.load %arg3[%c1, %c0_9, %c0_10] : memref<9x24x512xf32, #tpu.memory_space<vmem>>, vector<1x24x512xf32>
    %13 = vector.shape_cast %12 : vector<1x24x512xf32> to vector<24x512xf32>
    %c2 = arith.constant 2 : index
    %c0_11 = arith.constant 0 : index
    %c0_12 = arith.constant 0 : index
    %14 = vector.load %arg3[%c2, %c0_11, %c0_12] : memref<9x24x512xf32, #tpu.memory_space<vmem>>, vector<1x24x512xf32>
    %15 = vector.shape_cast %14 : vector<1x24x512xf32> to vector<24x512xf32>
    %c3 = arith.constant 3 : index
    %c0_13 = arith.constant 0 : index
    %c0_14 = arith.constant 0 : index
    %16 = vector.load %arg3[%c3, %c0_13, %c0_14] : memref<9x24x512xf32, #tpu.memory_space<vmem>>, vector<1x24x512xf32>
    %17 = vector.shape_cast %16 : vector<1x24x512xf32> to vector<24x512xf32>
    %c4 = arith.constant 4 : index
    %c0_15 = arith.constant 0 : index
    %c0_16 = arith.constant 0 : index
    %18 = vector.load %arg3[%c4, %c0_15, %c0_16] : memref<9x24x512xf32, #tpu.memory_space<vmem>>, vector<1x24x512xf32>
    %19 = vector.shape_cast %18 : vector<1x24x512xf32> to vector<24x512xf32>
    %c5 = arith.constant 5 : index
    %c0_17 = arith.constant 0 : index
    %c0_18 = arith.constant 0 : index
    %20 = vector.load %arg3[%c5, %c0_17, %c0_18] : memref<9x24x512xf32, #tpu.memory_space<vmem>>, vector<1x24x512xf32>
    %21 = vector.shape_cast %20 : vector<1x24x512xf32> to vector<24x512xf32>
    %c6 = arith.constant 6 : index
    %c0_19 = arith.constant 0 : index
    %c0_20 = arith.constant 0 : index
    %22 = vector.load %arg3[%c6, %c0_19, %c0_20] : memref<9x24x512xf32, #tpu.memory_space<vmem>>, vector<1x24x512xf32>
    %23 = vector.shape_cast %22 : vector<1x24x512xf32> to vector<24x512xf32>
    %c7 = arith.constant 7 : index
    %c0_21 = arith.constant 0 : index
    %c0_22 = arith.constant 0 : index
    %24 = vector.load %arg3[%c7, %c0_21, %c0_22] : memref<9x24x512xf32, #tpu.memory_space<vmem>>, vector<1x24x512xf32>
    %25 = vector.shape_cast %24 : vector<1x24x512xf32> to vector<24x512xf32>
    %c8 = arith.constant 8 : index
    %c0_23 = arith.constant 0 : index
    %c0_24 = arith.constant 0 : index
    %26 = vector.load %arg3[%c8, %c0_23, %c0_24] : memref<9x24x512xf32, #tpu.memory_space<vmem>>, vector<1x24x512xf32>
    %27 = vector.shape_cast %26 : vector<1x24x512xf32> to vector<24x512xf32>
    %28 = arith.mulf %11, %8 : vector<24x512xf32>
    %29 = arith.mulf %13, %7 : vector<24x512xf32>
    %30 = arith.addf %28, %29 : vector<24x512xf32>
    %31 = arith.mulf %15, %9 : vector<24x512xf32>
    %32 = arith.addf %30, %31 : vector<24x512xf32>
    %33 = arith.mulf %17, %8 : vector<24x512xf32>
    %34 = arith.mulf %19, %7 : vector<24x512xf32>
    %35 = arith.addf %33, %34 : vector<24x512xf32>
    %36 = arith.mulf %21, %9 : vector<24x512xf32>
    %37 = arith.addf %35, %36 : vector<24x512xf32>
    %38 = arith.mulf %23, %8 : vector<24x512xf32>
    %39 = arith.mulf %25, %7 : vector<24x512xf32>
    %40 = arith.addf %38, %39 : vector<24x512xf32>
    %41 = arith.mulf %27, %9 : vector<24x512xf32>
    %42 = arith.addf %40, %41 : vector<24x512xf32>
    %c16_i32 = arith.constant 16 : i32
    %43 = tpu.dynamic_rotate %32 by %c16_i32 dim 1 : vector<24x512xf32>, i32 -> vector<24x512xf32>
    %44 = arith.addf %37, %43 : vector<24x512xf32>
    %c496_i32 = arith.constant 496 : i32
    %45 = tpu.dynamic_rotate %42 by %c496_i32 dim 1 : vector<24x512xf32>, i32 -> vector<24x512xf32>
    %46 = arith.addf %44, %45 : vector<24x512xf32>
    %c0_25 = arith.constant 0 : index
    %c0_26 = arith.constant 0 : index
    %47 = vector.load %arg4[%c0_25, %c0_26] : memref<24x512xf32, #tpu.memory_space<vmem>>, vector<24x512xf32>
    %48 = arith.addf %46, %47 : vector<24x512xf32>
    %cst_27 = arith.constant 0.000000e+00 : f32
    %cst_28 = arith.constant 6.000000e+00 : f32
    %49 = vector.broadcast %cst_27 : f32 to vector<24x512xf32>
    %50 = arith.maximumf %49, %48 : vector<24x512xf32>
    %51 = vector.broadcast %cst_28 : f32 to vector<24x512xf32>
    %52 = arith.minimumf %51, %50 : vector<24x512xf32>
    %c0_29 = arith.constant 0 : index
    %c0_30 = arith.constant 0 : index
    %53 = vector.load %arg5[%c0_29, %c0_30] : memref<4x24xf32, #tpu.memory_space<vmem>>, vector<4x24xf32>
    %cst_31 = arith.constant dense<0.000000e+00> : vector<4x512xf32>
    %54 = tpu.matmul %53, %52, %cst_31 {dimension_numbers = #tpu.dot_dimension_numbers<[1], [0], [0], [1], [0, 0, 1, 1], [], []>} : vector<4x24xf32>, vector<24x512xf32>, vector<4x512xf32> -> vector<4x512xf32>
    %c0_32 = arith.constant 0 : index
    %c0_33 = arith.constant 0 : index
    %55 = vector.load %arg6[%c0_32, %c0_33] : memref<4x512xf32, #tpu.memory_space<vmem>>, vector<4x512xf32>
    %56 = arith.addf %54, %55 : vector<4x512xf32>
    %57 = vector.extract_strided_slice %1 {offsets = [0, 0], sizes = [4, 512], strides = [1, 1]} : vector<5x512xf32> to vector<4x512xf32>
    %58 = arith.addf %56, %57 : vector<4x512xf32>
    %c0_34 = arith.constant 0 : index
    %c0_35 = arith.constant 0 : index
    %c0_36 = arith.constant 0 : index
    %59 = vector.load %arg7[%c0_34, %c0_35, %c0_36] : memref<1x4x512xf32, #tpu.memory_space<vmem>>, vector<1x4x512xf32>
    %60 = vector.shape_cast %59 : vector<1x4x512xf32> to vector<4x512xf32>
    %61 = vector.shape_cast %58 : vector<4x512xf32> to vector<1x4x512xf32>
    tpu.vector_store %arg7[%c0_34, %c0_35, %c0_36], %61 {strides = array<i32>} : memref<1x4x512xf32, #tpu.memory_space<vmem>>, vector<1x4x512xf32>,
    return
  }
  func.func @transform_0(%arg0: i32) -> (i32, i32, i32) {
    %c0_i32 = arith.constant 0 : i32
    %c0_i32_0 = arith.constant 0 : i32
    %c0_i32_1 = arith.constant 0 : i32
    return %arg0, %c0_i32, %c0_i32_0 : i32, i32, i32
  }
  func.func @transform_1(%arg0: i32) -> (i32, i32) {
    %c0_i32 = arith.constant 0 : i32
    %c0_i32_0 = arith.constant 0 : i32
    %c0_i32_1 = arith.constant 0 : i32
    return %c0_i32, %c0_i32_0 : i32, i32
  }
  func.func @transform_2(%arg0: i32) -> (i32, i32, i32) {
    %c0_i32 = arith.constant 0 : i32
    %c0_i32_0 = arith.constant 0 : i32
    %c0_i32_1 = arith.constant 0 : i32
    %c0_i32_2 = arith.constant 0 : i32
    return %c0_i32, %c0_i32_0, %c0_i32_1 : i32, i32, i32
  }
  func.func @transform_3(%arg0: i32) -> (i32, i32) {
    %c0_i32 = arith.constant 0 : i32
    %c0_i32_0 = arith.constant 0 : i32
    %c0_i32_1 = arith.constant 0 : i32
    return %c0_i32, %c0_i32_0 : i32, i32
  }
  func.func @transform_4(%arg0: i32) -> (i32, i32) {
    %c0_i32 = arith.constant 0 : i32
    %c0_i32_0 = arith.constant 0 : i32
    %c0_i32_1 = arith.constant 0 : i32
    return %c0_i32, %c0_i32_0 : i32, i32
  }
  func.func @transform_5(%arg0: i32) -> (i32, i32) {
    %c0_i32 = arith.constant 0 : i32
    %c0_i32_0 = arith.constant 0 : i32
    %c0_i32_1 = arith.constant 0 : i32
    return %c0_i32, %c0_i32_0 : i32, i32
  }
  func.func @transform_6(%arg0: i32) -> (i32, i32, i32) {
    %c0_i32 = arith.constant 0 : i32
    %c0_i32_0 = arith.constant 0 : i32
    %c0_i32_1 = arith.constant 0 : i32
    return %arg0, %c0_i32, %c0_i32_0 : i32, i32, i32
  }
}

</mosaic_0001>

<bundles_post_ra>
// kernel: tpu_custom_call.1
= control target key start
LH: loop header
LB: loop body
LE: loop exit
PB: predicated region body
PF: predicated region fallthrough
CT: control target
= control target key end

     0   :  { %11 = vsyncpa [#allocation3], 0  ;;  %s1715_s0 = inlined_call_operand.vmem [shape: f32[1,5,512], index: 0, kind: input, shape index: {}]   ;;  %s1716_s1 = inlined_call_operand.vmem [shape: f32[24,5], index: 1, kind: input, shape index: {}]   ;;  %s1717_s2 = inlined_call_operand.hbm [shape: f32[9,24,512], index: 2, kind: input, shape index: {}]   ;;  %s1718_s3 = inlined_call_operand.hbm [shape: f32[24,512], index: 3, kind: input, shape index: {}]   ;;  %s1719_s4 = inlined_call_operand.vmem [shape: f32[4,24], index: 4, kind: input, shape index: {}]   ;;  %s1720_s5 = inlined_call_operand.vmem [shape: f32[4,512], index: 5, kind: input, shape index: {}]   ;;  %s1721_s6 = inlined_call_operand.hbm [shape: f32[1,4,512], index: 6, kind: output, shape index: {}]  }
   0x1   :  { %12 = vsyncpa [#allocation6], 0 }
   0x2   :  { %13 = vsyncpa [#allocation4], 0  ;;  %s1083_s21 = smov [#allocation2]   ;;  %s1011_s25 = scalar_lea.hbm %s1717_s2, 13824 }
   0x3   :  { %s23_s22 = sshll.u32 %s1083_s21, 4  ;;  %p1012_p0 = scmp.ne.s32.totalorder %s1717_s2, %s1011_s25  ;;  %s24_s22 = int_to_ptr.vmem [resolvable:$true] %s23_s22 }
   0x4   :  { %p1015_p1 = scmp.lt.u32.totalorder %s1011_s25, %s1717_s2 }
   0x6   :  { %p1017_p2 = pnand %p1015_p1, %p1012_p0 }
   0x8   :  { %1020 = shalt.err (!%p1017_p2)
}
   0x9   :  { %s1021_s30 = scalar_lea.vmem %s24_s22, 13824  ;;  %p1026_p4 = scmp.lt.s32.totalorder %s24_s22, %s24_s22 }
   0xa   :  { %p1022_p3 = scmp.ne.s32.totalorder %s24_s22, %s1021_s30  ;;  %p1027_p5 = scmp.lt.s32.totalorder %s1021_s30, %s1021_s30 }
   0xc   :  { %p1028_p6 = por %p1027_p5, %p1026_p4 }
   0xe   :  { %p1029_p7 = pnand %p1028_p6, %p1022_p3 }
  0x10   :  { %1032 = shalt.err (!%p1029_p7)
}
  0x11   :  { %s1084_s7 = smov 512   ;;  %s1085_s8 = smov 32  }
  0x12   :  { %29 = dma.hbm_to_vmem [thread:$0]  %s1717_s2, 13824, %s24_s22, [#allocation3], %s1084_s7, %s1084_s7, %s1085_s8  }
  0x13   :  { %s1086_s11 = smov [#allocation5]   ;;  %s1033_s15 = scalar_lea.hbm %s1718_s3, 1536 }
  0x14   :  { %s35_s12 = sshll.u32 %s1086_s11, 4  ;;  %p1034_p8 = scmp.ne.s32.totalorder %s1718_s3, %s1033_s15  ;;  %s36_s12 = int_to_ptr.vmem [resolvable:$true] %s35_s12 }
  0x15   :  { %p1037_p9 = scmp.lt.u32.totalorder %s1033_s15, %s1718_s3 }
  0x17   :  { %p1039_p10 = pnand %p1037_p9, %p1034_p8 }
  0x19   :  { %1042 = shalt.err (!%p1039_p10)
}
  0x1a   :  { %s1043_s20 = scalar_lea.vmem %s36_s12, 1536  ;;  %p1048_p12 = scmp.lt.s32.totalorder %s36_s12, %s36_s12 }
  0x1b   :  { %p1044_p11 = scmp.ne.s32.totalorder %s36_s12, %s1043_s20  ;;  %p1049_p13 = scmp.lt.s32.totalorder %s1043_s20, %s1043_s20 }
  0x1d   :  { %p1050_p0 = por %p1049_p13, %p1048_p12 }
  0x1f   :  { %p1051_p1 = pnand %p1050_p0, %p1044_p11 }
  0x21   :  { %1054 = shalt.err (!%p1051_p1)
}
  0x22   :  { %41 = dma.hbm_to_vmem [thread:$0]  %s1718_s3, 1536, %s36_s12, [#allocation6], %s1084_s7, %s1084_s7, %s1085_s8  }
  0x23   :  { %1077 = dma.done.wait [#allocation3], 13824  }
  0x24   :  { %1078 = vsyncadd [#allocation3], 4294953472 }
  0x25   :  { %1079 = dma.done.wait [#allocation6], 1536  }
  0x26   :  { %1080 = vsyncadd [#allocation6], 4294965760  ;;  %v1087_v0 = vmov 0.0   ;;  %vm69_vm0 = vcmask 1044480   ;;  %vm59_vm1 = vcmask 39936   ;;  %v56_v4 = vld [vmem:[%s1716_s1] sm:$0xff]  ;;  %v296_v44 = vlaneseq }
  0x27   :  { %146 = vmatprep.mubr.f32.mxu0 %v1087_v0  ;;  %229 = vmatprep.mubr.f32.mxu1 %v1087_v0  ;;  %v53_v1 = vld [vmem:[%s1715_s0 + $0x8] sm:$0x1f]  ;;  %v52_v2 = vld [vmem:[%s1715_s0] sm:$0x1f]  ;;  %v55_v3 = vld [vmem:[%s1715_s0 + $0x18] sm:$0x1f] }
  0x28   :  { %975 = vmatprep.subr.msk.mxu0 %vm69_vm0, %v53_v1  ;;  %980 = vmatprep.subr.msk.mxu1 %vm69_vm0, %v55_v3  ;;  %v54_v5 = vld [vmem:[%s1715_s0 + $0x10] sm:$0x1f]  ;;  %v57_v6 = vld [vmem:[%s1716_s1 + $0x8] sm:$0xff]  ;;  %s1089_s11 = smov 127   ;;  %v1251_v45 = vand.u32 127, %v296_v44  ;;  %v403_v3 = vld [vmem:[#allocation2 + $0x198] sm:$0xff] }
  0x29   :  { %976 = vmatpush1.msk.msra.mxu0 %vm69_vm0, %v52_v2  ;;  %981 = vmatpush1.msk.msra.mxu1 %vm69_vm0, %v54_v5  ;;  %v58_v7 = vld [vmem:[%s1716_s1 + $0x10] sm:$0xff]  ;;  %s1088_s1 = smov 1   ;;  %v388_v47 = vld [vmem:[#allocation2 + $0x128] sm:$0xff]  ;;  %v400_v2 = vld [vmem:[#allocation2 + $0x180] sm:$0xff]  ;;  %s1090_s12 = smov 16   ;;  %vm799_vm6 = vcmask 195584  }
  0x2a   :  { %977 = vmatmul.mubr.msk.f32.vlgmr.msra.gmra.mrb[0].mxu0 %vm59_vm1, %v56_v4  ;;  %982 = vmatmul.mubr.msk.f32.vlgmr.msra.gmra.mrb[0].mxu1 %vm59_vm1, %v56_v4  ;;  %vm298_vm2 = vcmp.lt.s32.totalorder %v1251_v45, 1  ;;  %v401_v48 = vld [vmem:[#allocation2 + $0x188] sm:$0xff]  ;;  %v389_v53 = vld [vmem:[#allocation2 + $0x130] sm:$0xff]  ;;  %v348_v4 = vld [vmem:[#allocation2] sm:$0xff]  ;;  %vm335_vm3 = vcmp.lt.s32.totalorder %v1251_v45, 127  ;;  %s1091_s13 = smov 112  }
  0x2b   :  { %235 = vmatprep.mubr.f32.mxu1 %v1087_v0  ;;  %152 = vmatprep.mubr.f32.mxu0 %v1087_v0  ;;  %v402_v54 = vld [vmem:[#allocation2 + $0x190] sm:$0xff]  ;;  %v387_v5 = vld [vmem:[#allocation2 + $0x120] sm:$0xff]  ;;  %v394_v44 = vld [vmem:[#allocation2 + $0x158] sm:$0xff]  ;;  %vm668_vm4 = vcmp.lt.s32.totalorder %v1251_v45, 16  ;;  %vm717_vm5 = vcmp.lt.s32.totalorder %v1251_v45, 112  ;;  %s1092_s23 = smov [#allocation7]  }
  0x2c   :  { %s965_s24 = sshll.u32 %s1092_s23, 4  ;;  %s966_s24 = int_to_ptr.vmem [resolvable:$true] %s965_s24 }
  0x2d   :  { %s1055_s27 = scalar_lea.vmem %s966_s24, 256  ;;  %p1060_p3 = scmp.lt.s32.totalorder %s966_s24, %s966_s24 }
  0x2e   :  { %983 = vmatmul.mubr.msk.f32.gmra.mrb[2].mxu1 %vm59_vm1, %v57_v6  ;;  %978 = vmatmul.mubr.msk.f32.gmra.mrb[2].mxu0 %vm59_vm1, %v57_v6  ;;  %v390_v6 = vld [vmem:[#allocation2 + $0x138] sm:$0xff]  ;;  %p1056_p2 = scmp.ne.s32.totalorder %s966_s24, %s1055_s27  ;;  %p1061_p4 = scmp.lt.s32.totalorder %s1055_s27, %s1055_s27 }
  0x2f   :  { %158 = vmatprep.mubr.f32.mxu0 %v1087_v0  ;;  %241 = vmatprep.mubr.f32.mxu1 %v1087_v0 }
  0x30   :  { %p1062_p5 = por %p1061_p4, %p1060_p3 }
  0x32   :  { %979 = vmatmul.mubr.msk.f32.gmra.mrb[4].mxu0 %vm59_vm1, %v58_v7  ;;  %984 = vmatmul.mubr.msk.f32.gmra.mrb[4].mxu1 %vm59_vm1, %v58_v7  ;;  %p1063_p6 = pnand %p1062_p5, %p1056_p2 }
  0x33   :  { %867 = vmatprep.mubr.f32.mxu0 %v1087_v0  ;;  %938 = vmatprep.mubr.f32.mxu1 %v1087_v0 }
  0xfd   :  { %v148_v8 = vpop.f32.mrb[0].mxu0  ;;  %v231_v9 = vpop.f32.mrb[0].mxu1 }
  0xfe   :  { %v248_v10 = vmax.f32 %v148_v8, 0.0  ;;  %v150_v11 = vpop.f32.mrb[1].mxu0  ;;  %v250_v12 = vmax.f32 %v231_v9, 0.0  ;;  %v233_v13 = vpop.f32.mrb[1].mxu1  ;;  %v361_v8 = vld [vmem:[#allocation2 + $0x60] sm:$0xff] }
  0xff   :  { %v249_v14 = vmax.f32 %v150_v11, 0.0  ;;  %v251_v30 = vmax.f32 %v233_v13, 0.0  ;;  %v393_v13 = vld [vmem:[#allocation2 + $0x150] sm:$0xff] }
 0x100   :  { %v1179_v15 = vmin.f32 %v248_v10, 6.0  ;;  %v1183_v19 = vmin.f32 %v250_v12, 6.0 }
 0x101   :  { %v1181_v16 = vmin.f32 %v249_v14, 6.0  ;;  %v237_v17 = vpop.f32.mrb[2].mxu1  ;;  %v154_v18 = vpop.f32.mrb[2].mxu0  ;;  %v1205_v32 = vmin.f32 %v251_v30, 6.0  ;;  %v406_v14 = vld [vmem:[#allocation2 + $0x1b0] sm:$0xff] }
 0x102   :  { %v254_v20 = vmax.f32 %v237_v17, 0.0  ;;  %272 = vrot.lane.b32.xlu0 %v1179_v15, %s1088_s1  ;;  %v239_v21 = vpop.f32.mrb[3].mxu1  ;;  %v156_v22 = vpop.f32.mrb[3].mxu0  ;;  %v252_v23 = vmax.f32 %v154_v18, 0.0  ;;  %v538_v59 = vmul.f32 %v402_v54, %v1183_v19  ;;  %v536_v12 = vmul.f32 %v400_v2, %v1179_v15  ;;  %v364_v54 = vld [vmem:[#allocation2 + $0x78] sm:$0xff] }
 0x103   :  { %278 = vrot.lane.b32.xlu1 %v1181_v16, %s1088_s1  ;;  %v253_v31 = vmax.f32 %v156_v22, 0.0  ;;  %v255_v33 = vmax.f32 %v239_v21, 0.0  ;;  %v537_v52 = vmul.f32 %v401_v48, %v1181_v16  ;;  %v539_v9 = vmul.f32 %v403_v3, %v1205_v32  ;;  %v349_v22 = vld [vmem:[#allocation2 + $0x8] sm:$0xff] }
 0x104   :  { %v1189_v24 = vmin.f32 %v254_v20, 6.0  ;;  %v1193_v29 = vmin.f32 %v252_v23, 6.0 }
 0x105   :  { %v160_v25 = vpop.f32.mrb[4].mxu0  ;;  %v243_v26 = vpop.f32.mrb[4].mxu1  ;;  %v1207_v34 = vmin.f32 %v253_v31, 6.0  ;;  %v1213_v35 = vmin.f32 %v255_v33, 6.0 }
 0x106   :  { %1729 = vst [vmem:[#allocation11_spill] sm:$0xff] %v1189_v24  ;;  %284 = vrot.lane.b32.xlu0 %v1183_v19, %s1088_s1  ;;  %v162_v27 = vpop.f32.mrb[5].mxu0  ;;  %v245_v28 = vpop.f32.mrb[5].mxu1  ;;  %v256_v36 = vmax.f32 %v160_v25, 0.0  ;;  %v258_v39 = vmax.f32 %v243_v26, 0.0  ;;  %v374_v25 = vld [vmem:[#allocation2 + $0xc0] sm:$0xff]  ;;  %v476_v26 = vmul.f32 %v361_v8, %v1179_v15  ;;  %v542_v30 = vmul.f32 %v406_v14, %v1189_v24 }
 0x107   :  { %286 = vrot.lane.b32.xlu1 %v1189_v24, %s1088_s1  ;;  %v257_v37 = vmax.f32 %v162_v27, 0.0  ;;  %v259_v41 = vmax.f32 %v245_v28, 0.0  ;;  %v365_v8 = vld [vmem:[#allocation2 + $0x80] sm:$0xff] }
 0x108   :  { %v1223_v38 = vmin.f32 %v256_v36, 6.0  ;;  %v1231_v42 = vmin.f32 %v258_v39, 6.0  ;;  %v362_v36 = vld [vmem:[#allocation2 + $0x68] sm:$0xff] }
 0x109   :  { %v1227_v40 = vmin.f32 %v257_v37, 6.0  ;;  %v1235_v43 = vmin.f32 %v259_v41, 6.0  ;;  %v375_v37 = vld [vmem:[#allocation2 + $0xc8] sm:$0xff]  ;;  %v477_v2 = vmul.f32 %v362_v36, %v1181_v16 }
 0x10a   :  { %311 = vrot.lane.b32.xlu0 %v1179_v15, %s1089_s11  ;;  %1731 = vst [vmem:[#allocation13_spill] sm:$0xff] %v1231_v42  ;;  %v440_v36 = vld [vmem:[#allocation2 + $0x2a8] sm:$0xff] }
 0x10b   :  { %313 = vrot.lane.b32.xlu1 %v1193_v29, %s1089_s11  ;;  %1730 = vst [vmem:[#allocation12_spill] sm:$0xff] %v1227_v40  ;;  %1732 = vst [vmem:[#allocation14_spill] sm:$0xff] %v1235_v43 }
 0x10e   :  { %323 = vrot.lane.b32.xlu0 %v1183_v19, %s1089_s11 }
 0x10f   :  { %325 = vrot.lane.b32.xlu1 %v1189_v24, %s1089_s11 }
 0x112   :  { %290 = vrot.lane.b32.xlu0 %v1205_v32, %s1088_s1 }
 0x113   :  { %280 = vrot.lane.b32.xlu1 %v1207_v34, %s1088_s1 }
 0x116   :  { %317 = vrot.lane.b32.xlu0 %v1181_v16, %s1089_s11 }
 0x117   :  { %292 = vrot.lane.b32.xlu1 %v1213_v35, %s1088_s1 }
 0x11a   :  { %329 = vrot.lane.b32.xlu0 %v1205_v32, %s1089_s11 }
 0x11b   :  { %319 = vrot.lane.b32.xlu1 %v1207_v34, %s1089_s11 }
 0x11e   :  { %274 = vrot.lane.b32.xlu0 %v1193_v29, %s1088_s1 }
 0x11f   :  { %331 = vrot.lane.b32.xlu1 %v1213_v35, %s1089_s11 }
 0x122   :  { %276 = vrot.lane.b32.xlu0 %v1223_v38, %s1088_s1 }
 0x123   :  { %282 = vrot.lane.b32.xlu1 %v1227_v40, %s1088_s1 }
 0x126   :  { %288 = vrot.lane.b32.xlu0 %v1231_v42, %s1088_s1 }
 0x127   :  { %294 = vrot.lane.b32.xlu1 %v1235_v43, %s1088_s1 }
 0x12a   :  { %315 = vrot.lane.b32.xlu0 %v1223_v38, %s1089_s11 }
 0x12b   :  { %321 = vrot.lane.b32.xlu1 %v1227_v40, %s1089_s11 }
 0x12e   :  { %327 = vrot.lane.b32.xlu0 %v1231_v42, %s1089_s11 }
 0x12f   :  { %333 = vrot.lane.b32.xlu1 %v1235_v43, %s1089_s11 }
 0x174   :  { %v273_v46 = vpop.permute.xlu0 %272 }
 0x175   :  { %v279_v49 = vpop.permute.xlu1 %278 }
 0x176   :  { %v1256_v50 = vsel %vm298_vm2, %v273_v46, %v279_v49 }
 0x177   :  { %v525_v51 = vmul.f32 %v388_v47, %v1256_v50  ;;  %v465_v48 = vmul.f32 %v349_v22, %v1256_v50 }
 0x178   :  { %v285_v55 = vpop.permute.xlu0 %284 }
 0x179   :  { %v1260_v56 = vadd.f32 %v537_v52, %v525_v51  ;;  %v1264_v57 = vsel %vm298_vm2, %v279_v49, %v285_v55  ;;  %v287_v58 = vpop.permute.xlu1 %286 }
 0x17a   :  { %v526_v60 = vmul.f32 %v389_v53, %v1264_v57  ;;  %v363_v53 = vld [vmem:[#allocation2 + $0x70] sm:$0xff] }
 0x17c   :  { %v1268_v61 = vadd.f32 %v538_v59, %v526_v60  ;;  %v1270_v62 = vpop.permute.xlu0 %311  ;;  %v404_v59 = vld [vmem:[#allocation2 + $0x1a0] sm:$0xff]  ;;  %v405_v60 = vld [vmem:[#allocation2 + $0x1a8] sm:$0xff] }
 0x17d   :  { %v1272_v63 = vpop.permute.xlu1 %313 }
 0x17e   :  { %1733 = vst [vmem:[#allocation15_spill] sm:$0xff] %v1268_v61 }
 0x180   :  { %v1274_v0 = vpop.permute.xlu0 %323 }
 0x181   :  { %v1276_v1 = vpop.permute.xlu1 %325 }
 0x184   :  { %v291_v7 = vpop.permute.xlu0 %290 }
 0x185   :  { %v1281_v10 = vsel %vm298_vm2, %v285_v55, %v291_v7  ;;  %v1285_v11 = vsel %vm298_vm2, %v291_v7, %v273_v46  ;;  %v1288_v17 = vpop.permute.xlu1 %280  ;;  %v407_v46 = vld [vmem:[#allocation2 + $0x1b8] sm:$0xff] }
 0x186   :  { %v464_v18 = vmul.f32 %v348_v4, %v1285_v11  ;;  %v524_v20 = vmul.f32 %v387_v5, %v1285_v11  ;;  %v527_v21 = vmul.f32 %v390_v6, %v1281_v10  ;;  %v1297_v23 = vsel %vm298_vm2, %v1288_v17, %v287_v58 }
 0x187   :  { %v530_v31 = vmul.f32 %v393_v13, %v1297_v23  ;;  %v543_v4 = vmul.f32 %v407_v46, %v1213_v35  ;;  %v350_v13 = vld [vmem:[#allocation2 + $0x10] sm:$0xff]  ;;  %v392_v46 = vld [vmem:[#allocation2 + $0x148] sm:$0xff] }
 0x188   :  { %v1300_v27 = vadd.f32 %v536_v12, %v524_v20  ;;  %v1302_v28 = vadd.f32 %v539_v9, %v527_v21  ;;  %v318_v33 = vpop.permute.xlu0 %317  ;;  %v488_v52 = vadd.f32 %v476_v26, %v464_v18  ;;  %v366_v9 = vld [vmem:[#allocation2 + $0x88] sm:$0xff]  ;;  %v439_v12 = vld [vmem:[#allocation2 + $0x2a0] sm:$0xff]  ;;  %v410_v18 = vld [vmem:[#allocation2 + $0x1d0] sm:$0xff]  ;;  %v1332_v20 = vmul.f32 %v364_v54, %v1205_v32 }
 0x189   :  { %v1309_v39 = vsel %vm335_vm3, %v318_v33, %v1274_v0  ;;  %v1314_v41 = vsel %vm335_vm3, %v1270_v62, %v318_v33  ;;  %v293_v47 = vpop.permute.xlu1 %292  ;;  %v1317_v49 = vadd.f32 %v542_v30, %v530_v31  ;;  %v367_v21 = vld [vmem:[#allocation2 + $0x90] sm:$0xff]  ;;  %v541_v26 = vmul.f32 %v405_v60, %v1207_v34  ;;  %v409_v31 = vld [vmem:[#allocation2 + $0x1c8] sm:$0xff]  ;;  %v408_v33 = vld [vmem:[#allocation2 + $0x1c0] sm:$0xff] }
 0x18a   :  { %1734 = vst [vmem:[#allocation16_spill] sm:$0xff] %v1300_v27  ;;  %1735 = vst [vmem:[#allocation17_spill] sm:$0xff] %v1302_v28  ;;  %v500_v51 = vmul.f32 %v374_v25, %v1314_v41  ;;  %v1322_v55 = vsel %vm298_vm2, %v287_v58, %v293_v47  ;;  %v501_v3 = vmul.f32 %v375_v37, %v1309_v39  ;;  %v376_v37 = vld [vmem:[#allocation2 + $0xd0] sm:$0xff]  ;;  %v352_v54 = vld [vmem:[#allocation2 + $0x20] sm:$0xff] }
 0x18b   :  { %1736 = vst [vmem:[#allocation18_spill] sm:$0xff] %v1317_v49  ;;  %v531_v5 = vmul.f32 %v394_v44, %v1322_v55  ;;  %v478_v58 = vmul.f32 %v363_v53, %v1183_v19  ;;  %v540_v25 = vmul.f32 %v404_v59, %v1193_v29  ;;  %v489_v30 = vadd.f32 %v477_v2, %v465_v48  ;;  %v391_v59 = vld [vmem:[#allocation2 + $0x140] sm:$0xff] }
 0x18c   :  { %v330_v6 = vpop.permute.xlu0 %329  ;;  %v512_v7 = vadd.f32 %v500_v51, %v488_v52  ;;  %v480_v51 = vmul.f32 %v365_v8, %v1193_v29  ;;  %v1346_v52 = vmul.f32 %v366_v9, %v1207_v34  ;;  %v1349_v53 = vmul.f32 %v439_v12, %v1179_v15  ;;  %v443_v28 = vld [vmem:[#allocation2 + $0x2c0] sm:$0xff] }
 0x18d   :  { %v1328_v14 = vpop.permute.xlu1 %319  ;;  %v1334_v22 = vadd.f32 %v543_v4, %v531_v5  ;;  %v1342_v44 = vsel %vm335_vm3, %v1274_v0, %v330_v6  ;;  %v466_v48 = vmul.f32 %v350_v13, %v1264_v57  ;;  %v513_v2 = vadd.f32 %v501_v3, %v489_v30  ;;  %v411_v0 = vld [vmem:[#allocation2 + $0x1d8] sm:$0xff]  ;;  %v353_v30 = vld [vmem:[#allocation2 + $0x28] sm:$0xff]  ;;  %v426_v27 = vld [vmem:[#allocation2 + $0x240] sm:$0xff] }
 0x18e   :  { %644 = vrot.lane.b32.xlu0 %v512_v7, %s1090_s12  ;;  %v1353_v4 = vmul.f32 %v410_v18, %v1231_v42  ;;  %v1356_v5 = vmul.f32 %v367_v21, %v1189_v24  ;;  %v351_v7 = vld [vmem:[#allocation2 + $0x18] sm:$0xff]  ;;  %v545_v9 = vmul.f32 %v409_v31, %v1227_v40  ;;  %v1367_v12 = vmul.f32 %v408_v33, %v1223_v38  ;;  %v378_v33 = vld [vmem:[#allocation2 + $0xe0] sm:$0xff]  ;;  %v396_v24 = vld [vmem:[#allocation2 + $0x168] sm:$0xff] }
 0x18f   :  { %1737 = vst [vmem:[#allocation19_spill] sm:$0xff] %v1334_v22  ;;  %v1370_v3 = vmul.f32 %v440_v36, %v1181_v16  ;;  %v368_v13 = vld [vmem:[#allocation2 + $0x98] sm:$0xff]  ;;  %v1375_v21 = vsel %vm335_vm3, %v330_v6, %v1270_v62  ;;  %v441_v16 = vld [vmem:[#allocation2 + $0x2b0] sm:$0xff]  ;;  %v1388_v36 = vsel %vm335_vm3, %v1272_v63, %v1328_v14  ;;  %v490_v22 = vadd.f32 %v478_v58, %v466_v48 }
 0x190   :  { %v275_v60 = vpop.permute.xlu0 %274  ;;  %v377_v18 = vld [vmem:[#allocation2 + $0xd8] sm:$0xff]  ;;  %v1399_v49 = vmul.f32 %v368_v13, %v1213_v35  ;;  %v1406_v61 = vmul.f32 %v441_v16, %v1183_v19  ;;  %v584_v16 = vmul.f32 %v426_v27, %v1285_v11  ;;  %v395_v27 = vld [vmem:[#allocation2 + $0x160] sm:$0xff] }
 0x191   :  { %v1361_v8 = vsel %vm298_vm2, %v275_v60, %v1288_v17  ;;  %v1363_v15 = vpop.permute.xlu1 %331  ;;  %v502_v17 = vmul.f32 %v376_v37, %v1342_v44  ;;  %v1380_v42 = vsel %vm298_vm2, %v293_v47, %v275_v60  ;;  %v1393_v37 = vmul.f32 %v411_v0, %v1235_v43  ;;  %v442_v47 = vld [vmem:[#allocation2 + $0x2b8] sm:$0xff]  ;;  %v427_v60 = vld [vmem:[#allocation2 + $0x248] sm:$0xff] }
 0x192   :  { %v529_v31 = vmul.f32 %v392_v46, %v1361_v8  ;;  %650 = vrot.lane.b32.xlu0 %v513_v2, %s1090_s12  ;;  %v468_v62 = vmul.f32 %v352_v54, %v1380_v42  ;;  %v528_v6 = vmul.f32 %v391_v59, %v1380_v42  ;;  %v467_v46 = vmul.f32 %v351_v7, %v1281_v10 }
 0x193   :  { %v503_v54 = vmul.f32 %v377_v18, %v1375_v21  ;;  %v469_v59 = vmul.f32 %v353_v30, %v1361_v8  ;;  %v504_v7 = vmul.f32 %v378_v33, %v1388_v36  ;;  %v514_v48 = vadd.f32 %v502_v17, %v490_v22  ;;  %v397_v30 = vld [vmem:[#allocation2 + $0x170] sm:$0xff] }
 0x194   :  { %v1396_v2 = vadd.f32 %v541_v26, %v529_v31  ;;  %v277_v40 = vpop.permute.xlu0 %276  ;;  %v1403_v0 = vadd.f32 %v540_v25, %v528_v6  ;;  %v452_v26 = vld [vmem:[#allocation2 + $0x300] sm:$0xff]  ;;  %v492_v13 = vadd.f32 %v480_v51, %v468_v62  ;;  %v585_v31 = vmul.f32 %v427_v60, %v1256_v50  ;;  %v354_v33 = vld [vmem:[#allocation2 + $0x30] sm:$0xff]  ;;  %v379_v6 = vld [vmem:[#allocation2 + $0xe8] sm:$0xff] }
 0x195   :  { %v283_v43 = vpop.permute.xlu1 %282  ;;  %v1416_v25 = vmul.f32 %v443_v28, %v1193_v29  ;;  %v1419_v19 = vmul.f32 %v442_v47, %v1205_v32  ;;  %v1426_v22 = vsel %vm335_vm3, %v1328_v14, %v1276_v1  ;;  %v398_v51 = vld [vmem:[#allocation2 + $0x178] sm:$0xff]  ;;  %v491_v29 = vadd.f32 %v1332_v20, %v467_v46  ;;  %v428_v28 = vld [vmem:[#allocation2 + $0x250] sm:$0xff]  ;;  %v444_v46 = vld [vmem:[#allocation2 + $0x2c8] sm:$0xff] }
 0x196   :  { %v1411_v58 = vsel %vm298_vm2, %v277_v40, %v283_v43  ;;  %656 = vrot.lane.b32.xlu0 %v514_v48, %s1090_s12  ;;  %v516_v50 = vadd.f32 %v504_v7, %v492_v13  ;;  %v620_v32 = vmul.f32 %v452_v26, %v1314_v41  ;;  %v493_v14 = vadd.f32 %v1346_v52, %v469_v59  ;;  %v380_v47 = vld [vmem:[#allocation2 + $0xf0] sm:$0xff]  ;;  %v453_v52 = vld [vmem:[#allocation2 + $0x308] sm:$0xff]  ;;  %v355_v13 = vld [vmem:[#allocation2 + $0x38] sm:$0xff] }
 0x197   :  { %v533_v18 = vmul.f32 %v396_v24, %v1411_v58  ;;  %v1442_v60 = vsel %vm335_vm3, %v1276_v1, %v1363_v15  ;;  %v470_v26 = vmul.f32 %v354_v33, %v1297_v23  ;;  %v505_v59 = vmul.f32 %v379_v6, %v1426_v22  ;;  %v369_v6 = vld [vmem:[#allocation2 + $0xa0] sm:$0xff] }
 0x198   :  { %v289_v24 = vpop.permute.xlu0 %288  ;;  %646 = vrot.lane.b32.xlu1 %v516_v50, %s1090_s12  ;;  %v586_v48 = vmul.f32 %v428_v28, %v1264_v57  ;;  %v608_v33 = vadd.f32 %v1349_v53, %v584_v16  ;;  %v413_v50 = vld [vmem:[#allocation2 + $0x1e0] sm:$0xff]  ;;  %v1471_v28 = vmul.f32 %v444_v46, %v1207_v34  ;;  %v1478_v53 = vsel %vm335_vm3, %v1363_v15, %v1272_v63  ;;  %v416_v34 = vld [vmem:[#allocation2 + $0x1f8] sm:$0xff]  ;;  %v454_v46 = vld [vmem:[#allocation2 + $0x310] sm:$0xff] }
 0x199   :  { %v1431_v17 = vadd.f32 %v545_v9, %v533_v18  ;;  %v1435_v11 = vsel %vm298_vm2, %v283_v43, %v289_v24  ;;  %v295_v62 = vpop.permute.xlu1 %294  ;;  %v515_v43 = vadd.f32 %v503_v54, %v491_v29  ;;  %v517_v29 = vadd.f32 %v505_v59, %v493_v14 }
 0x19a   :  { %v534_v20 = vmul.f32 %v397_v30, %v1435_v11  ;;  %v1448_v9 = vsel %vm298_vm2, %v289_v24, %v295_v62  ;;  %v1454_v7 = vsel %vm298_vm2, %v295_v62, %v277_v40  ;;  %v429_v24 = vld [vmem:[#allocation2 + $0x258] sm:$0xff]  ;;  %v432_v40 = vld [vmem:[#allocation2 + $0x270] sm:$0xff]  ;;  %v621_v62 = vmul.f32 %v453_v52, %v1309_v39 }
 0x19b   :  { %v535_v1 = vmul.f32 %v398_v51, %v1448_v9  ;;  %v532_v54 = vmul.f32 %v395_v27, %v1454_v7  ;;  %662 = vrot.lane.b32.xlu0 %v515_v43, %s1090_s12  ;;  %v506_v51 = vmul.f32 %v380_v47, %v1442_v60  ;;  %v414_v27 = vld [vmem:[#allocation2 + $0x1e8] sm:$0xff]  ;;  %v381_v43 = vld [vmem:[#allocation2 + $0xf8] sm:$0xff]  ;;  %v471_v14 = vmul.f32 %v355_v13, %v1322_v55  ;;  %v415_v47 = vld [vmem:[#allocation2 + $0x1f0] sm:$0xff] }
 0x19c   :  { %v1459_v18 = vadd.f32 %v1353_v4, %v534_v20  ;;  %v1463_v30 = vpop.permute.xlu0 %315  ;;  %v430_v20 = vld [vmem:[#allocation2 + $0x260] sm:$0xff]  ;;  %652 = vrot.lane.b32.xlu1 %v517_v29, %s1090_s12  ;;  %v494_v52 = vadd.f32 %v1356_v5, %v470_v26  ;;  %v609_v59 = vadd.f32 %v1370_v3, %v585_v31  ;;  %v587_v63 = vmul.f32 %v429_v24, %v1281_v10  ;;  %v418_v13 = vld [vmem:[#allocation2 + $0x208] sm:$0xff] }
 0x19d   :  { %v1468_v57 = vadd.f32 %v1393_v37, %v535_v1  ;;  %v322_v4 = vpop.permute.xlu1 %321  ;;  %v1481_v16 = vadd.f32 %v1367_v12, %v532_v54  ;;  %v632_v37 = vadd.f32 %v620_v32, %v608_v33  ;;  %v1488_v1 = vmul.f32 %v369_v6, %v1223_v38  ;;  %v455_v32 = vld [vmem:[#allocation2 + $0x318] sm:$0xff]  ;;  %v457_v54 = vld [vmem:[#allocation2 + $0x328] sm:$0xff]  ;;  %v417_v31 = vld [vmem:[#allocation2 + $0x200] sm:$0xff] }
 0x19e   :  { %v1492_v15 = vmul.f32 %v432_v40, %v1297_v23  ;;  %v560_v12 = vmul.f32 %v413_v50, %v1314_v41  ;;  %v610_v5 = vadd.f32 %v1406_v61, %v586_v48  ;;  %v561_v3 = vmul.f32 %v414_v27, %v1309_v39  ;;  %v431_v26 = vld [vmem:[#allocation2 + $0x268] sm:$0xff]  ;;  %v456_v48 = vld [vmem:[#allocation2 + $0x320] sm:$0xff] }
 0x19f   :  { %693 = vrot.lane.b32.xlu0 %v632_v37, %s1091_s13  ;;  %v588_v33 = vmul.f32 %v430_v20, %v1380_v42  ;;  %v507_v10 = vmul.f32 %v381_v43, %v1478_v53  ;;  %v518_v6 = vadd.f32 %v506_v51, %v494_v52  ;;  %v562_v41 = vmul.f32 %v415_v47, %v1342_v44  ;;  %v419_v42 = vld [vmem:[#allocation2 + $0x210] sm:$0xff]  ;;  %v420_v20 = vld [vmem:[#allocation2 + $0x218] sm:$0xff]  ;;  %v356_v47 = vld [vmem:[#allocation2 + $0x40] sm:$0xff] }
 0x1a0   :  { %v328_v23 = vpop.permute.xlu0 %327  ;;  %v563_v40 = vmul.f32 %v416_v34, %v1375_v21  ;;  %v622_v50 = vmul.f32 %v454_v46, %v1342_v44  ;;  %v633_v29 = vadd.f32 %v621_v62, %v609_v59  ;;  %v623_v61 = vmul.f32 %v455_v32, %v1375_v21  ;;  %v422_v44 = vld [vmem:[#allocation2 + $0x228] sm:$0xff]  ;;  %v423_v62 = vld [vmem:[#allocation2 + $0x230] sm:$0xff]  ;;  %v421_v34 = vld [vmem:[#allocation2 + $0x220] sm:$0xff] }
 0x1a1   :  { %v334_v24 = vpop.permute.xlu1 %333  ;;  %v565_v39 = vmul.f32 %v418_v13, %v1426_v22  ;;  %v625_v27 = vmul.f32 %v457_v54, %v1426_v22  ;;  %658 = vrot.lane.b32.xlu1 %v518_v6, %s1090_s12  ;;  %v495_v51 = vadd.f32 %v1399_v49, %v471_v14  ;;  %v564_v43 = vmul.f32 %v417_v31, %v1388_v36  ;;  %v382_v54 = vld [vmem:[#allocation2 + $0x100] sm:$0xff]  ;;  %v358_v6 = vld [vmem:[#allocation2 + $0x50] sm:$0xff] }
 0x1a2   :  { %v589_v37 = vmul.f32 %v431_v26, %v1361_v8  ;;  %v1512_v21 = vsel %vm335_vm3, %v322_v4, %v328_v23  ;;  %v1516_v22 = vsel %vm335_vm3, %v328_v23, %v334_v24  ;;  %v1522_v49 = vsel %vm335_vm3, %v1463_v30, %v322_v4  ;;  %v424_v8 = vld [vmem:[#allocation2 + $0x238] sm:$0xff] }
 0x1a3   :  { %699 = vrot.lane.b32.xlu0 %v633_v29, %s1091_s13  ;;  %v1527_v14 = vsel %vm335_vm3, %v334_v24, %v1463_v30  ;;  %v519_v46 = vadd.f32 %v507_v10, %v495_v51  ;;  %v612_v52 = vadd.f32 %v1416_v25, %v588_v33  ;;  %v624_v59 = vmul.f32 %v456_v48, %v1388_v36  ;;  %v1739_v48 = vld [vmem:[#allocation16_spill] sm:$0xff]  ;;  %v1740_v51 = vld [vmem:[#allocation17_spill] sm:$0xff] }
 0x1a4   :  { %v566_v32 = vmul.f32 %v419_v42, %v1442_v60  ;;  %v567_v13 = vmul.f32 %v420_v20, %v1478_v53  ;;  %v634_v31 = vadd.f32 %v622_v50, %v610_v5  ;;  %v472_v4 = vmul.f32 %v356_v47, %v1454_v7  ;;  %v1738_v5 = vld [vmem:[#allocation15_spill] sm:$0xff] }
 0x1a5   :  { %v569_v26 = vmul.f32 %v422_v44, %v1512_v21  ;;  %v570_v23 = vmul.f32 %v423_v62, %v1516_v22  ;;  %664 = vrot.lane.b32.xlu1 %v519_v46, %s1090_s12  ;;  %v1538_v30 = vadd.f32 %v561_v3, %v1260_v56  ;;  %v568_v25 = vmul.f32 %v421_v34, %v1522_v49  ;;  %v458_v3 = vld [vmem:[#allocation2 + $0x330] sm:$0xff] }
 0x1a6   :  { %v571_v36 = vmul.f32 %v424_v8, %v1527_v14  ;;  %v611_v33 = vadd.f32 %v1419_v19, %v587_v63  ;;  %v1545_v10 = vadd.f32 %v562_v41, %v1738_v5  ;;  %v508_v24 = vmul.f32 %v382_v54, %v1522_v49  ;;  %v445_v20 = vld [vmem:[#allocation2 + $0x2d0] sm:$0xff]  ;;  %v1741_v63 = vld [vmem:[#allocation18_spill] sm:$0xff]  ;;  %v1744_v54 = vld [vmem:[#allocation13_spill] sm:$0xff] }
 0x1a7   :  { %705 = vrot.lane.b32.xlu0 %v634_v31, %s1091_s13  ;;  %v636_v50 = vadd.f32 %v624_v59, %v612_v52  ;;  %v613_v29 = vadd.f32 %v1471_v28, %v589_v37  ;;  %v1550_v56 = vadd.f32 %v560_v12, %v1739_v48  ;;  %v1553_v47 = vadd.f32 %v563_v40, %v1740_v51  ;;  %v384_v44 = vld [vmem:[#allocation2 + $0x110] sm:$0xff]  ;;  %v459_v59 = vld [vmem:[#allocation2 + $0x338] sm:$0xff] }
 0x1a8   :  { %v635_v42 = vadd.f32 %v623_v61, %v611_v33  ;;  %v1556_v19 = vadd.f32 %v565_v39, %v1396_v2  ;;  %v1559_v41 = vadd.f32 %v566_v32, %v1741_v63  ;;  %v371_v62 = vld [vmem:[#allocation2 + $0xb0] sm:$0xff]  ;;  %v1563_v28 = vadd.f32 %v564_v43, %v1403_v0  ;;  %v433_v2 = vld [vmem:[#allocation2 + $0x278] sm:$0xff] }
 0x1a9   :  { %695 = vrot.lane.b32.xlu1 %v636_v50, %s1091_s13  ;;  %v1742_v12 = vld [vmem:[#allocation19_spill] sm:$0xff]  ;;  %v1569_v61 = vadd.f32 %v569_v26, %v1431_v17  ;;  %v1572_v40 = vadd.f32 %v570_v23, %v1459_v18  ;;  %v474_v39 = vmul.f32 %v358_v6, %v1435_v11  ;;  %v496_v34 = vadd.f32 %v1488_v1, %v472_v4  ;;  %v434_v17 = vld [vmem:[#allocation2 + $0x280] sm:$0xff]  ;;  %v446_v26 = vld [vmem:[#allocation2 + $0x2d8] sm:$0xff] }
 0x1aa   :  { %v1566_v37 = vadd.f32 %v567_v13, %v1742_v12  ;;  %v1578_v8 = vadd.f32 %v568_v25, %v1481_v16  ;;  %v1581_v0 = vadd.f32 %v571_v36, %v1468_v57  ;;  %v626_v43 = vmul.f32 %v458_v3, %v1442_v60  ;;  %v1743_v52 = vld [vmem:[#allocation11_spill] sm:$0xff]  ;;  %v460_v16 = vld [vmem:[#allocation2 + $0x340] sm:$0xff]  ;;  %v357_v60 = vld [vmem:[#allocation2 + $0x48] sm:$0xff] }
 0x1ab   :  { %711 = vrot.lane.b32.xlu0 %v635_v42, %s1091_s13  ;;  %v637_v46 = vadd.f32 %v625_v27, %v613_v29  ;;  %v602_v18 = vmul.f32 %v445_v20, %v1743_v52  ;;  %v510_v32 = vmul.f32 %v384_v44, %v1516_v22  ;;  %v520_v13 = vadd.f32 %v508_v24, %v496_v34  ;;  %v447_v4 = vld [vmem:[#allocation2 + $0x2e0] sm:$0xff]  ;;  %v436_v36 = vld [vmem:[#allocation2 + $0x290] sm:$0xff]  ;;  %v383_v6 = vld [vmem:[#allocation2 + $0x108] sm:$0xff] }
 0x1ac   :  { %v486_v31 = vmul.f32 %v371_v62, %v1744_v54  ;;  %v591_v1 = vmul.f32 %v433_v2, %v1322_v55  ;;  %v592_v27 = vmul.f32 %v434_v17, %v1454_v7  ;;  %v627_v25 = vmul.f32 %v459_v59, %v1478_v53  ;;  %v462_v48 = vld [vmem:[#allocation2 + $0x350] sm:$0xff]  ;;  %v359_v42 = vld [vmem:[#allocation2 + $0x58] sm:$0xff]  ;;  %v435_v34 = vld [vmem:[#allocation2 + $0x288] sm:$0xff] }
 0x1ad   :  { %701 = vrot.lane.b32.xlu1 %v637_v46, %s1091_s13  ;;  %v614_v57 = vadd.f32 %v602_v18, %v1492_v15  ;;  %v603_v5 = vmul.f32 %v446_v26, %v1213_v35  ;;  %v628_v55 = vmul.f32 %v460_v16, %v1522_v49  ;;  %v604_v50 = vmul.f32 %v447_v4, %v1223_v38  ;;  %v370_v15 = vld [vmem:[#allocation2 + $0xa8] sm:$0xff]  ;;  %v449_v3 = vld [vmem:[#allocation2 + $0x2f0] sm:$0xff]  ;;  %v1745_v51 = vld [vmem:[#allocation12_spill] sm:$0xff] }
 0x1ae   :  { %v498_v23 = vadd.f32 %v486_v31, %v474_v39  ;;  %v473_v29 = vmul.f32 %v357_v60, %v1411_v58  ;;  %v594_v53 = vmul.f32 %v436_v36, %v1435_v11  ;;  %v509_v49 = vmul.f32 %v383_v6, %v1512_v21  ;;  %v385_v38 = vld [vmem:[#allocation2 + $0x118] sm:$0xff]  ;;  %v1746_v52 = vld [vmem:[#allocation14_spill] sm:$0xff] }
 0x1af   :  { %648 = vrot.lane.b32.xlu0 %v520_v13, %s1090_s12  ;;  %v638_v33 = vadd.f32 %v626_v43, %v614_v57  ;;  %v615_v7 = vadd.f32 %v603_v5, %v591_v1  ;;  %v616_v35 = vadd.f32 %v604_v50, %v592_v27  ;;  %v485_v63 = vmul.f32 %v370_v15, %v1745_v51  ;;  %v372_v2 = vld [vmem:[#allocation2 + $0xb8] sm:$0xff]  ;;  %v461_v59 = vld [vmem:[#allocation2 + $0x348] sm:$0xff] }
 0x1b0   :  { %v522_v24 = vadd.f32 %v510_v32, %v498_v23  ;;  %v630_v44 = vmul.f32 %v462_v48, %v1516_v22  ;;  %v606_v12 = vmul.f32 %v449_v3, %v1744_v54  ;;  %v475_v39 = vmul.f32 %v359_v42, %v1448_v9  ;;  %v448_v32 = vld [vmem:[#allocation2 + $0x2e8] sm:$0xff]  ;;  %v437_v31 = vld [vmem:[#allocation2 + $0x298] sm:$0xff] }
 0x1b1   :  { %707 = vrot.lane.b32.xlu1 %v638_v33, %s1091_s13  ;;  %v639_v20 = vadd.f32 %v627_v25, %v615_v7  ;;  %v640_v62 = vadd.f32 %v628_v55, %v616_v35  ;;  %v497_v11 = vadd.f32 %v485_v63, %v473_v29  ;;  %v511_v17 = vmul.f32 %v385_v38, %v1527_v14  ;;  %v463_v57 = vld [vmem:[#allocation2 + $0x358] sm:$0xff] }
 0x1b2   :  { %v618_v43 = vadd.f32 %v606_v12, %v594_v53  ;;  %v487_v18 = vmul.f32 %v372_v2, %v1746_v52  ;;  %v593_v13 = vmul.f32 %v435_v34, %v1411_v58  ;;  %v629_v26 = vmul.f32 %v461_v59, %v1512_v21  ;;  %v450_v4 = vld [vmem:[#allocation2 + $0x2f8] sm:$0xff]  ;;  %v743_v59 = vld [vmem:[#allocation5 + $0x8] sm:$0xff] }
 0x1b3   :  { %660 = vrot.lane.b32.xlu0 %v522_v24, %s1090_s12  ;;  %v521_v46 = vadd.f32 %v509_v49, %v497_v11  ;;  %v605_v16 = vmul.f32 %v448_v32, %v1745_v51  ;;  %v595_v60 = vmul.f32 %v437_v31, %v1448_v9  ;;  %v631_v58 = vmul.f32 %v463_v57, %v1527_v14 }
 0x1b4   :  { %v642_v22 = vadd.f32 %v630_v44, %v618_v43  ;;  %v499_v54 = vadd.f32 %v487_v18, %v475_v39  ;;  %v607_v25 = vmul.f32 %v450_v4, %v1746_v52 }
 0x1b5   :  { %713 = vrot.lane.b32.xlu1 %v639_v20, %s1091_s13  ;;  %v617_v27 = vadd.f32 %v605_v16, %v593_v13  ;;  %v742_v20 = vld [vmem:[#allocation5] sm:$0xff] }
 0x1b6   :  { %v523_v1 = vadd.f32 %v511_v17, %v499_v54  ;;  %v619_v36 = vadd.f32 %v607_v25, %v595_v60  ;;  %v745_v60 = vld [vmem:[#allocation5 + $0x18] sm:$0xff] }
 0x1b7   :  { %697 = vrot.lane.b32.xlu0 %v640_v62, %s1091_s13  ;;  %v641_v23 = vadd.f32 %v629_v26, %v617_v27  ;;  %v744_v26 = vld [vmem:[#allocation5 + $0x10] sm:$0xff] }
 0x1b8   :  { %v643_v33 = vadd.f32 %v631_v58, %v619_v36 }
 0x1b9   :  { %654 = vrot.lane.b32.xlu1 %v521_v46, %s1090_s12 }
 0x1bb   :  { %709 = vrot.lane.b32.xlu0 %v642_v22, %s1091_s13 }
 0x1bd   :  { %666 = vrot.lane.b32.xlu1 %v523_v1, %s1090_s12 }
 0x1c1   :  { %703 = vrot.lane.b32.xlu1 %v641_v23, %s1091_s13 }
 0x1c5   :  { %715 = vrot.lane.b32.xlu1 %v643_v33, %s1091_s13 }
 0x200   :  { %v645_v21 = vpop.permute.xlu0 %644 }
 0x204   :  { %v651_v5 = vpop.permute.xlu0 %650 }
 0x205   :  { %v675_v42 = vsel %vm668_vm4, %v645_v21, %v651_v5 }
 0x206   :  { %v682_v62 = vadd.f32 %v675_v42, %v1538_v30  ;;  %v746_v30 = vld [vmem:[#allocation5 + $0x20] sm:$0xff] }
 0x208   :  { %v657_v55 = vpop.permute.xlu0 %656 }
 0x209   :  { %v672_v38 = vsel %vm668_vm4, %v651_v5, %v657_v55 }
 0x20a   :  { %v647_v6 = vpop.permute.xlu1 %646  ;;  %v683_v43 = vadd.f32 %v672_v38, %v1545_v10 }
 0x20d   :  { %v663_v24 = vpop.permute.xlu0 %662 }
 0x20e   :  { %v653_v9 = vpop.permute.xlu1 %652  ;;  %v678_v14 = vsel %vm668_vm4, %v663_v24, %v645_v21 }
 0x20f   :  { %v681_v53 = vadd.f32 %v678_v14, %v1550_v56  ;;  %v669_v56 = vsel %vm668_vm4, %v657_v55, %v663_v24  ;;  %v676_v12 = vsel %vm668_vm4, %v647_v6, %v653_v9 }
 0x210   :  { %v684_v18 = vadd.f32 %v669_v56, %v1553_v47  ;;  %v747_v47 = vld [vmem:[#allocation5 + $0x28] sm:$0xff] }
 0x211   :  { %v694_v50 = vpop.permute.xlu0 %693 }
 0x213   :  { %v659_v15 = vpop.permute.xlu1 %658 }
 0x214   :  { %v673_v13 = vsel %vm668_vm4, %v653_v9, %v659_v15 }
 0x215   :  { %v700_v29 = vpop.permute.xlu0 %699  ;;  %v687_v23 = vadd.f32 %v673_v13, %v1559_v41  ;;  %v750_v13 = vld [vmem:[#allocation5 + $0x40] sm:$0xff] }
 0x216   :  { %v724_v7 = vsel %vm717_vm5, %v694_v50, %v700_v29 }
 0x217   :  { %v665_v48 = vpop.permute.xlu1 %664  ;;  %v730_v35 = vadd.f32 %v724_v7, %v681_v53 }
 0x218   :  { %v679_v51 = vsel %vm668_vm4, %v665_v48, %v647_v6  ;;  %v670_v31 = vsel %vm668_vm4, %v659_v15, %v665_v48  ;;  %v749_v15 = vld [vmem:[#allocation5 + $0x38] sm:$0xff] }
 0x219   :  { %v706_v3 = vpop.permute.xlu0 %705  ;;  %v754_v2 = vadd.f32 %v742_v20, %v730_v35  ;;  %v685_v39 = vadd.f32 %v679_v51, %v1563_v28  ;;  %v686_v28 = vadd.f32 %v676_v12, %v1556_v19  ;;  %v688_v25 = vadd.f32 %v670_v31, %v1566_v37 }
 0x21a   :  { %v721_v44 = vsel %vm717_vm5, %v700_v29, %v706_v3 }
 0x21b   :  { %v696_v49 = vpop.permute.xlu1 %695  ;;  %v731_v17 = vadd.f32 %v721_v44, %v682_v62  ;;  %v766_v10 = vmax.f32 %v754_v2, 0.0 }
 0x21d   :  { %v712_v63 = vpop.permute.xlu0 %711  ;;  %v755_v4 = vadd.f32 %v743_v59, %v731_v17  ;;  %v778_v33 = vmin.f32 %v766_v10, 6.0 }
 0x21e   :  { %v718_v11 = vsel %vm717_vm5, %v706_v3, %v712_v63  ;;  %v727_v46 = vsel %vm717_vm5, %v712_v63, %v694_v50  ;;  %v748_v50 = vld [vmem:[#allocation5 + $0x30] sm:$0xff] }
 0x21f   :  { %v702_v34 = vpop.permute.xlu1 %701  ;;  %v732_v54 = vadd.f32 %v718_v11, %v683_v43  ;;  %v733_v1 = vadd.f32 %v727_v46, %v684_v18  ;;  %v767_v9 = vmax.f32 %v755_v4, 0.0  ;;  %v752_v4 = vld [vmem:[#allocation5 + $0x50] sm:$0xff] }
 0x220   :  { %v725_v52 = vsel %vm717_vm5, %v696_v49, %v702_v34 }
 0x221   :  { %v734_v22 = vadd.f32 %v725_v52, %v685_v39  ;;  %v649_v32 = vpop.permute.xlu0 %648  ;;  %v756_v36 = vadd.f32 %v744_v26, %v732_v54  ;;  %v757_v21 = vadd.f32 %v745_v60, %v733_v1  ;;  %v779_v63 = vmin.f32 %v767_v9, 6.0  ;;  %v751_v54 = vld [vmem:[#allocation5 + $0x48] sm:$0xff]  ;;  %v753_v60 = vld [vmem:[#allocation5 + $0x58] sm:$0xff] }
 0x223   :  { %v758_v16 = vadd.f32 %v746_v30, %v734_v22  ;;  %v708_v57 = vpop.permute.xlu1 %707  ;;  %v768_v3 = vmax.f32 %v756_v36, 0.0  ;;  %v769_v53 = vmax.f32 %v757_v21, 0.0 }
 0x224   :  { %v722_v27 = vsel %vm717_vm5, %v702_v34, %v708_v57 }
 0x225   :  { %v770_v58 = vmax.f32 %v758_v16, 0.0  ;;  %v735_v19 = vadd.f32 %v722_v27, %v686_v28  ;;  %v661_v6 = vpop.permute.xlu0 %660  ;;  %v780_v12 = vmin.f32 %v768_v3, 6.0  ;;  %v781_v2 = vmin.f32 %v769_v53, 6.0  ;;  %v1008_v53 = vld [vmem:[%s1715_s0 + $0x8] sm:$0x1f] }
 0x227   :  { %v782_v5 = vmin.f32 %v770_v58, 6.0  ;;  %v759_v55 = vadd.f32 %v747_v47, %v735_v19  ;;  %v714_v24 = vpop.permute.xlu1 %713 }
 0x228   :  { %v719_v29 = vsel %vm717_vm5, %v708_v57, %v714_v24  ;;  %v728_v14 = vsel %vm717_vm5, %v714_v24, %v696_v49  ;;  %v791_v24 = vld [vmem:[%s1720_s5] sm:$0xff] }
 0x229   :  { %v771_v48 = vmax.f32 %v759_v55, 0.0  ;;  %v736_v41 = vadd.f32 %v719_v29, %v687_v23  ;;  %v737_v7 = vadd.f32 %v728_v14, %v688_v25  ;;  %v989_v37 = vpack.c.bf16 %v782_v5, %v778_v33  ;;  %v698_v62 = vpop.permute.xlu0 %697 }
 0x22a   :  { %v795_v9 = vcombine.high %v791_v24, %v791_v24 }
 0x22b   :  { %v783_v42 = vmin.f32 %v771_v48, 6.0  ;;  %v760_v35 = vadd.f32 %v748_v50, %v736_v41  ;;  %v761_v20 = vadd.f32 %v749_v15, %v737_v7  ;;  %v655_v51 = vpop.permute.xlu1 %654  ;;  %v792_v50 = vld [vmem:[%s1720_s5 + $0x8] sm:$0xff]  ;;  %v1007_v7 = vld [vmem:[%s1715_s0] sm:$0x1f] }
 0x22c   :  { %v677_v34 = vsel %vm668_vm4, %v649_v32, %v655_v51  ;;  %v674_v22 = vsel %vm668_vm4, %v655_v51, %v661_v6  ;;  %v796_v41 = vcombine.high %v792_v50, %v792_v50 }
 0x22d   :  { %v772_v38 = vmax.f32 %v760_v35, 0.0  ;;  %v773_v44 = vmax.f32 %v761_v20, 0.0  ;;  %v987_v56 = vpack.c.bf16 %v783_v42, %v779_v63  ;;  %v690_v30 = vadd.f32 %v677_v34, %v1569_v61  ;;  %v710_v52 = vpop.permute.xlu0 %709 }
 0x22f   :  { %v784_v39 = vmin.f32 %v772_v38, 6.0  ;;  %v785_v11 = vmin.f32 %v773_v44, 6.0  ;;  %v667_v49 = vpop.permute.xlu1 %666  ;;  %988 = vmatprep.subr.bf16.mxu0 %v987_v56  ;;  %v1009_v38 = vld [vmem:[%s1715_s0 + $0x10] sm:$0x1f] }
 0x230   :  { %v680_v43 = vsel %vm668_vm4, %v667_v49, %v649_v32  ;;  %990 = vmatpush1.bf16.msra.mxu0 %v989_v37  ;;  %v671_v28 = vsel %vm668_vm4, %v661_v6, %v667_v49 }
 0x231   :  { %v991_v17 = vpack.c.bf16 %v785_v11, %v781_v2  ;;  %v993_v46 = vpack.c.bf16 %v784_v39, %v780_v12  ;;  %v689_v18 = vadd.f32 %v680_v43, %v1578_v8  ;;  %v691_v8 = vadd.f32 %v674_v22, %v1572_v40 }
 0x232   :  { %v692_v26 = vadd.f32 %v671_v28, %v1581_v0  ;;  %v790_v0 = vld [vmem:[%s1719_s4] sm:$0xf] }
 0x233   :  { %992 = vmatprep.subr.bf16.mxu1 %v991_v17  ;;  %v704_v59 = vpop.permute.xlu1 %703 }
 0x234   :  { %v723_v32 = vsel %vm717_vm5, %v704_v59, %v710_v52  ;;  %v726_v10 = vsel %vm717_vm5, %v698_v62, %v704_v59  ;;  %994 = vmatpush1.bf16.msra.mxu1 %v993_v46 }
 0x235   :  { %v738_v61 = vadd.f32 %v726_v10, %v689_v18  ;;  %v739_v31 = vadd.f32 %v723_v32, %v690_v30 }
 0x237   :  { %v762_v1 = vadd.f32 %v750_v13, %v738_v61  ;;  %v763_v16 = vadd.f32 %v751_v54, %v739_v31  ;;  %v716_v57 = vpop.permute.xlu1 %715 }
 0x238   :  { %v720_v47 = vsel %vm717_vm5, %v710_v52, %v716_v57  ;;  %v729_v27 = vsel %vm717_vm5, %v716_v57, %v698_v62  ;;  %v1010_v62 = vld [vmem:[%s1715_s0 + $0x18] sm:$0x1f] }
 0x239   :  { %v774_v58 = vmax.f32 %v762_v1, 0.0  ;;  %v740_v19 = vadd.f32 %v720_v47, %v691_v8  ;;  %v741_v23 = vadd.f32 %v729_v27, %v692_v26  ;;  %v775_v25 = vmax.f32 %v763_v16, 0.0 }
 0x23b   :  { %v786_v36 = vmin.f32 %v774_v58, 6.0  ;;  %v764_v33 = vadd.f32 %v752_v4, %v740_v19  ;;  %v765_v40 = vadd.f32 %v753_v60, %v741_v23  ;;  %v787_v21 = vmin.f32 %v775_v25, 6.0 }
 0x23d   :  { %v776_v5 = vmax.f32 %v764_v33, 0.0  ;;  %807 = vmatprep.subr.mxu0 %v787_v21  ;;  %v777_v55 = vmax.f32 %v765_v40, 0.0 }
 0x23e   :  { %808 = vmatpush1.msra.mxu0 %v786_v36 }
 0x23f   :  { %v788_v6 = vmin.f32 %v776_v5, 6.0  ;;  %v789_v45 = vmin.f32 %v777_v55, 6.0  ;;  %985 = vmatmul.mubr.msk.f32.vlgmr.msra.gmra.mrb[6].mxu0 %vm799_vm6, %v790_v0 }
 0x241   :  { %878 = vmatprep.subr.mxu1 %v789_v45 }
 0x242   :  { %879 = vmatpush1.msra.mxu1 %v788_v6 }
 0x243   :  { %986 = vmatmul.mubr.msk.f32.vlgmr.msra.gmra.mrb[6].mxu1 %vm799_vm6, %v790_v0 }
 0x312   :  { %v869_v15 = vpop.f32.mrb[6].mxu0 }
 0x313   :  { %v870_v29 = vadd.f32 %v869_v15, %v791_v24  ;;  %v871_v14 = vpop.f32.mrb[7].mxu0 }
 0x314   :  { %v872_v48 = vadd.f32 %v871_v14, %v795_v9 }
 0x315   :  { %v945_v37 = vadd.f32 %v1007_v7, %v870_v29 }
 0x316   :  { %v940_v3 = vpop.f32.mrb[6].mxu1  ;;  %v946_v42 = vadd.f32 %v1008_v53, %v872_v48 }
 0x317   :  { %v941_v35 = vadd.f32 %v940_v3, %v792_v50  ;;  %v942_v20 = vpop.f32.mrb[7].mxu1 }
 0x318   :  { %v953_v51 = vcombine.low %v945_v37, %v946_v42  ;;  %v943_v63 = vadd.f32 %v942_v20, %v796_v41 }
 0x319   :  { %v947_v44 = vadd.f32 %v1009_v38, %v941_v35 }
 0x31a   :  { %957 = vst [vmem:[#allocation7] sm:$0xff] %v953_v51  ;;  %v948_v56 = vadd.f32 %v1010_v62, %v943_v63 }
 0x31c   :  { %v954_v12 = vcombine.low %v947_v44, %v948_v56 }
 0x31e   :  { %958 = vst [vmem:[#allocation7 + $0x8] sm:$0xff] %v954_v12 }
 0x31f   :  { %1066 = shalt.err (!%p1063_p6)
}
 0x320   :  { %s1067_s29 = scalar_lea.hbm %s1721_s6, 256 }
 0x321   :  { %p1068_p7 = scmp.ne.s32.totalorder %s1721_s6, %s1067_s29  ;;  %p1071_p8 = scmp.lt.u32.totalorder %s1067_s29, %s1721_s6 }
 0x323   :  { %p1073_p9 = pnand %p1071_p8, %p1068_p7 }
 0x325   :  { %1076 = shalt.err (!%p1073_p9)
}
 0x326   :  { %968 = dma.vmem_to_hbm [thread:$0]  %s966_s24, 256, %s1721_s6, [#allocation4]  }
 0x327   :  { %1081 = dma.done.wait [#allocation4], 256  }
 0x328   :  { %1082 = vsyncadd [#allocation4], 4294967040 }
 0x329   :  { %972 = vsyncpa [#allocation3], 1 }
 0x32a   :  { %973 = vsyncpa [#allocation6], 1 }
 0x32b   :  { %974 = vsyncpa [#allocation4], 1 }

</bundles_post_ra>
